<compile_context>
chip_gen: v7x
topology: tpu7x:2x2x1
jax: 0.10.0
libtpu: 0.0.40
codegen_flags: <defaults>
</compile_context>

<pallas_src>
import jax
import jax.numpy as jnp
from jax.experimental import pallas as pl
from jax.experimental.pallas import tpu as pltpu


def surrogate_kernel(xt_ref, w_in_ref, b_in_ref, w_d1_ref, b_d1_ref,
                     w_d2_ref, b_d2_ref, o_ref):
    # x tile arrives f32; cast to bf16 in VMEM (cheap VPU cast, avoids an
    # extra HBM pass for a boundary cast).
    xt = xt_ref[...].astype(jnp.bfloat16)                       # (D_in, blk)
    # inlayer + ReLU:  h = relu(W_in @ x + b_in)                # (H, blk)
    h = jnp.dot(w_in_ref[...], xt, preferred_element_type=jnp.float32)
    h = jnp.maximum(h + b_in_ref[...], 0.0)
    # dvn[0] Linear + dvn[1] ReLU                               # (Hh, blk)
    h1 = jnp.dot(w_d1_ref[...], h.astype(jnp.bfloat16),
                 preferred_element_type=jnp.float32)
    h1 = jnp.maximum(h1 + b_d1_ref[...], 0.0)
    # TODO(synk): dvn[2] Dropout is identity in eval mode; training-mode
    # stochastic dropout (pltpu.prng_random_bits mask) is not implemented.
    # dvn[3] final Linear                                       # (O, blk)
    y = jnp.dot(w_d2_ref[...], h1.astype(jnp.bfloat16),
                preferred_element_type=jnp.float32)
    o_ref[...] = (y + b_d2_ref[...]).astype(o_ref.dtype)


def _round_up(n, m):
    return ((n + m - 1) // m) * m


def _choose_block_b(B, requested):
    """Pick a lane-aligned batch tile.

    256 is a multiple of 128 (v5e lanes/MXU) and of 256 (v6e/v7x MXU width).
    For large B, cap the tile so the grid has >= 2 steps, letting
    dimension_semantics=("parallel",) shard across v7x's 2 TensorCores.
    """
    lane = 256
    if B <= lane:
        return lane
    blk = _round_up(min(requested, _round_up(B, lane)), lane)
    if -(-B // blk) < 2:                       # grid would be a single step
        blk = max(lane, _round_up(-(-B // 2), lane))
    return blk


def nn_surrogate_forward(x, params, *, block_b=2048):
    """x: [B, D_in] float32.  params: weights in PyTorch (out, in) layout,
    biases as (out, 1) float32."""
    B, D_in = x.shape
    H = params["w_in"].shape[0]
    Hh = params["w_d1"].shape[0]
    O = params["w_d2"].shape[0]

    blk = _choose_block_b(B, block_b)
    grid = (-(-B // blk),)                     # cdiv(B, blk)
    B_pad = grid[0] * blk

    # Lane-dense layout: batch on lanes.  One small transpose of x outside;
    # no pad and no boundary dtype cast (f32 is cast in-kernel).
    x_t = x.astype(jnp.float32).T              # (D_in, B)

    w_in = params["w_in"].astype(jnp.bfloat16)     # (H, D_in)
    w_d1 = params["w_d1"].astype(jnp.bfloat16)     # (Hh, H)
    w_d2 = params["w_d2"].astype(jnp.bfloat16)     # (O, Hh)
    b_in = params["b_in"].astype(jnp.float32)      # (H, 1)
    b_d1 = params["b_d1"].astype(jnp.float32)      # (Hh, 1)
    b_d2 = params["b_d2"].astype(jnp.float32)      # (O, 1)

    def rowmap(i):   # x / output tiles march along the batch (lane) axis
        return (0, i)

    def fullmap(i):  # weights / biases stay resident
        return (0, 0)

    # NOTE: last input block may be clipped when B % blk != 0; the garbage
    # lanes it produces in the output are column-local and sliced off below.
    out = pl.pallas_call(
        surrogate_kernel,
        out_shape=jax.ShapeDtypeStruct((O, B_pad), jnp.float32),
        grid_spec=pltpu.PrefetchScalarGridSpec(
            num_scalar_prefetch=0,
            grid=grid,
            in_specs=[
                pl.BlockSpec((D_in, blk), rowmap),   # x^T tile (f32)
                pl.BlockSpec((H, D_in), fullmap),    # w_in (resident bf16)
                pl.BlockSpec((H, 1), fullmap),       # b_in
                pl.BlockSpec((Hh, H), fullmap),      # w_d1
                pl.BlockSpec((Hh, 1), fullmap),      # b_d1
                pl.BlockSpec((O, Hh), fullmap),      # w_d2
                pl.BlockSpec((O, 1), fullmap),       # b_d2
            ],
            out_specs=pl.BlockSpec((O, blk), rowmap),
        ),
        compiler_params=pltpu.CompilerParams(
            dimension_semantics=("parallel",)),
    )(x_t, w_in, b_in, w_d1, b_d1, w_d2, b_d2)

    return out[:, :B].T                        # (B, O)


def init_params(key, input_dim, hidden_dim, out_dim):
    """Deterministic synthetic params; weights in PyTorch (out, in) layout,
    biases as (out, 1)."""
    ks = jax.random.split(key, 6)
    half = hidden_dim // 2
    scale = 0.1
    return {
        "w_in": scale * jax.random.normal(ks[0], (hidden_dim, input_dim), jnp.float32),
        "b_in": scale * jax.random.normal(ks[1], (hidden_dim, 1), jnp.float32),
        "w_d1": scale * jax.random.normal(ks[2], (half, hidden_dim), jnp.float32),
        "b_d1": scale * jax.random.normal(ks[3], (half, 1), jnp.float32),
        "w_d2": scale * jax.random.normal(ks[4], (out_dim, half), jnp.float32),
        "b_d2": scale * jax.random.normal(ks[5], (out_dim, 1), jnp.float32),
    }


def reference_forward_bf16(x, p):
    """Mirrors the kernel's mixed precision: bf16 operands, f32 accumulation."""
    xb = x.astype(jnp.bfloat16)
    h = jnp.dot(xb, p["w_in"].astype(jnp.bfloat16).T,
                preferred_element_type=jnp.float32) + p["b_in"][:, 0]
    h = jnp.maximum(h, 0.0)
    h1 = jnp.dot(h.astype(jnp.bfloat16), p["w_d1"].astype(jnp.bfloat16).T,
                 preferred_element_type=jnp.float32) + p["b_d1"][:, 0]
    h1 = jnp.maximum(h1, 0.0)
    return jnp.dot(h1.astype(jnp.bfloat16), p["w_d2"].astype(jnp.bfloat16).T,
                   preferred_element_type=jnp.float32) + p["b_d2"][:, 0]


def reference_forward_f32(x, p):
    h = jnp.maximum(x @ p["w_in"].T + p["b_in"][:, 0], 0.0)
    h1 = jnp.maximum(h @ p["w_d1"].T + p["b_d1"][:, 0], 0.0)
    return h1 @ p["w_d2"].T + p["b_d2"][:, 0]


if __name__ == "__main__":
    key = jax.random.PRNGKey(0)
    kx, kp = jax.random.split(key)

    # small shapes: batch=300 (ragged -> 2 grid steps with a clipped tail),
    # input=16, hidden=64 (dvn hidden = 32), out=4
    B, D_in, H, O = 300, 16, 64, 4
    x = jax.random.normal(kx, (B, D_in), jnp.float32)
    params = init_params(kp, D_in, H, O)

    y = nn_surrogate_forward(x, params)
    y = jax.block_until_ready(y)
    assert y.shape == (B, O)

    y_ref_bf16 = reference_forward_bf16(x, params)
    y_ref_f32 = reference_forward_f32(x, params)
    assert jnp.allclose(y, y_ref_bf16, atol=2e-3, rtol=2e-3), \
        "mismatch vs bf16-emulated reference"
    assert jnp.allclose(y, y_ref_f32, atol=5e-2, rtol=5e-2), \
        "mismatch vs f32 reference"

    print("KERNEL_OK")
</pallas_src>

<mosaic_0001>
module attributes {stable_mosaic.version = 11 : i64} {
  func.func @surrogate_kernel(%arg0: i32, %arg1: memref<16x256xf32, #tpu.memory_space<vmem>>, %arg2: memref<64x16xbf16, #tpu.memory_space<vmem>>, %arg3: memref<64x1xf32, #tpu.memory_space<vmem>>, %arg4: memref<32x64xbf16, #tpu.memory_space<vmem>>, %arg5: memref<32x1xf32, #tpu.memory_space<vmem>>, %arg6: memref<4x32xbf16, #tpu.memory_space<vmem>>, %arg7: memref<4x1xf32, #tpu.memory_space<vmem>>, %arg8: memref<4x256xf32, #tpu.memory_space<vmem>>) attributes {dimension_semantics = [#tpu.dimension_semantics<parallel>], iteration_bounds = array<i64: 2>, scalar_prefetch = 0 : i64, scratch_operands = 0 : i64, tpu.core_type = #tpu.core_type<tc>, window_params = [{transform_indices = @transform_0, window_bounds = array<i64: 16, 256>}, {pipeline_mode = #tpu.pipeline_mode<synchronous>, transform_indices = @transform_1, window_bounds = array<i64: 64, 16>}, {pipeline_mode = #tpu.pipeline_mode<synchronous>, transform_indices = @transform_2, window_bounds = array<i64: 64, 1>}, {pipeline_mode = #tpu.pipeline_mode<synchronous>, transform_indices = @transform_3, window_bounds = array<i64: 32, 64>}, {pipeline_mode = #tpu.pipeline_mode<synchronous>, transform_indices = @transform_4, window_bounds = array<i64: 32, 1>}, {pipeline_mode = #tpu.pipeline_mode<synchronous>, transform_indices = @transform_5, window_bounds = array<i64: 4, 32>}, {pipeline_mode = #tpu.pipeline_mode<synchronous>, transform_indices = @transform_6, window_bounds = array<i64: 4, 1>}, {transform_indices = @transform_7, window_bounds = array<i64: 4, 256>}]} {
    %c0 = arith.constant 0 : index
    %c0_0 = arith.constant 0 : index
    %0 = vector.load %arg1[%c0, %c0_0] : memref<16x256xf32, #tpu.memory_space<vmem>>, vector<16x256xf32>
    %1 = arith.truncf %0 : vector<16x256xf32> to vector<16x256xbf16>
    %c0_1 = arith.constant 0 : index
    %c0_2 = arith.constant 0 : index
    %2 = vector.load %arg2[%c0_1, %c0_2] : memref<64x16xbf16, #tpu.memory_space<vmem>>, vector<64x16xbf16>
    %cst = arith.constant dense<0.000000e+00> : vector<64x256xf32>
    %3 = tpu.matmul %2, %1, %cst {dimension_numbers = #tpu.dot_dimension_numbers<[1], [0], [0], [1], [0, 0, 1, 1], [], []>} : vector<64x16xbf16>, vector<16x256xbf16>, vector<64x256xf32> -> vector<64x256xf32>
    %c0_3 = arith.constant 0 : index
    %c0_4 = arith.constant 0 : index
    %4 = vector.load %arg3[%c0_3, %c0_4] : memref<64x1xf32, #tpu.memory_space<vmem>>, vector<64x1xf32>
    %5 = vector.broadcast %4 : vector<64x1xf32> to vector<64x256xf32>
    %6 = arith.addf %3, %5 : vector<64x256xf32>
    %cst_5 = arith.constant 0.000000e+00 : f32
    %7 = vector.broadcast %cst_5 : f32 to vector<64x256xf32>
    %8 = arith.maximumf %6, %7 : vector<64x256xf32>
    %c0_6 = arith.constant 0 : index
    %c0_7 = arith.constant 0 : index
    %9 = vector.load %arg4[%c0_6, %c0_7] : memref<32x64xbf16, #tpu.memory_space<vmem>>, vector<32x64xbf16>
    %10 = arith.truncf %8 : vector<64x256xf32> to vector<64x256xbf16>
    %cst_8 = arith.constant dense<0.000000e+00> : vector<32x256xf32>
    %11 = tpu.matmul %9, %10, %cst_8 {dimension_numbers = #tpu.dot_dimension_numbers<[1], [0], [0], [1], [0, 0, 1, 1], [], []>} : vector<32x64xbf16>, vector<64x256xbf16>, vector<32x256xf32> -> vector<32x256xf32>
    %c0_9 = arith.constant 0 : index
    %c0_10 = arith.constant 0 : index
    %12 = vector.load %arg5[%c0_9, %c0_10] : memref<32x1xf32, #tpu.memory_space<vmem>>, vector<32x1xf32>
    %13 = vector.broadcast %12 : vector<32x1xf32> to vector<32x256xf32>
    %14 = arith.addf %11, %13 : vector<32x256xf32>
    %cst_11 = arith.constant 0.000000e+00 : f32
    %15 = vector.broadcast %cst_11 : f32 to vector<32x256xf32>
    %16 = arith.maximumf %14, %15 : vector<32x256xf32>
    %c0_12 = arith.constant 0 : index
    %c0_13 = arith.constant 0 : index
    %17 = vector.load %arg6[%c0_12, %c0_13] : memref<4x32xbf16, #tpu.memory_space<vmem>>, vector<4x32xbf16>
    %18 = arith.truncf %16 : vector<32x256xf32> to vector<32x256xbf16>
    %cst_14 = arith.constant dense<0.000000e+00> : vector<4x256xf32>
    %19 = tpu.matmul %17, %18, %cst_14 {dimension_numbers = #tpu.dot_dimension_numbers<[1], [0], [0], [1], [0, 0, 1, 1], [], []>} : vector<4x32xbf16>, vector<32x256xbf16>, vector<4x256xf32> -> vector<4x256xf32>
    %c0_15 = arith.constant 0 : index
    %c0_16 = arith.constant 0 : index
    %20 = vector.load %arg7[%c0_15, %c0_16] : memref<4x1xf32, #tpu.memory_space<vmem>>, vector<4x1xf32>
    %21 = vector.broadcast %20 : vector<4x1xf32> to vector<4x256xf32>
    %22 = arith.addf %19, %21 : vector<4x256xf32>
    %c0_17 = arith.constant 0 : index
    %c0_18 = arith.constant 0 : index
    %23 = vector.load %arg8[%c0_17, %c0_18] : memref<4x256xf32, #tpu.memory_space<vmem>>, vector<4x256xf32>
    tpu.vector_store %arg8[%c0_17, %c0_18], %22 {strides = array<i32>} : memref<4x256xf32, #tpu.memory_space<vmem>>, vector<4x256xf32>,
    return
  }
  func.func @transform_0(%arg0: i32) -> (i32, i32) {
    %c0_i32 = arith.constant 0 : i32
    %c0_i32_0 = arith.constant 0 : i32
    return %c0_i32, %arg0 : i32, i32
  }
  func.func @transform_1(%arg0: i32) -> (i32, i32) {
    %c0_i32 = arith.constant 0 : i32
    %c0_i32_0 = arith.constant 0 : i32
    %c0_i32_1 = arith.constant 0 : i32
    return %c0_i32, %c0_i32_0 : i32, i32
  }
  func.func @transform_2(%arg0: i32) -> (i32, i32) {
    %c0_i32 = arith.constant 0 : i32
    %c0_i32_0 = arith.constant 0 : i32
    %c0_i32_1 = arith.constant 0 : i32
    return %c0_i32, %c0_i32_0 : i32, i32
  }
  func.func @transform_3(%arg0: i32) -> (i32, i32) {
    %c0_i32 = arith.constant 0 : i32
    %c0_i32_0 = arith.constant 0 : i32
    %c0_i32_1 = arith.constant 0 : i32
    return %c0_i32, %c0_i32_0 : i32, i32
  }
  func.func @transform_4(%arg0: i32) -> (i32, i32) {
    %c0_i32 = arith.constant 0 : i32
    %c0_i32_0 = arith.constant 0 : i32
    %c0_i32_1 = arith.constant 0 : i32
    return %c0_i32, %c0_i32_0 : i32, i32
  }
  func.func @transform_5(%arg0: i32) -> (i32, i32) {
    %c0_i32 = arith.constant 0 : i32
    %c0_i32_0 = arith.constant 0 : i32
    %c0_i32_1 = arith.constant 0 : i32
    return %c0_i32, %c0_i32_0 : i32, i32
  }
  func.func @transform_6(%arg0: i32) -> (i32, i32) {
    %c0_i32 = arith.constant 0 : i32
    %c0_i32_0 = arith.constant 0 : i32
    %c0_i32_1 = arith.constant 0 : i32
    return %c0_i32, %c0_i32_0 : i32, i32
  }
  func.func @transform_7(%arg0: i32) -> (i32, i32) {
    %c0_i32 = arith.constant 0 : i32
    %c0_i32_0 = arith.constant 0 : i32
    return %c0_i32, %arg0 : i32, i32
  }
}

</mosaic_0001>

<bundles_post_ra>
// kernel: tpu_custom_call.1
= control target key start
LH: loop header
LB: loop body
LE: loop exit
PB: predicated region body
PF: predicated region fallthrough
CT: control target
= control target key end

     0   :  { %s2166_s0 = inlined_call_operand.vmem [shape: f32[16,300], index: 0, kind: input, shape index: {}]   ;;  %s2167_s1 = inlined_call_operand.vmem [shape: bf16[64,16], index: 1, kind: input, shape index: {}]   ;;  %s2168_s2 = inlined_call_operand.vmem [shape: f32[64,1], index: 2, kind: input, shape index: {}]   ;;  %s2169_s3 = inlined_call_operand.vmem [shape: bf16[32,64], index: 3, kind: input, shape index: {}]   ;;  %s2170_s4 = inlined_call_operand.vmem [shape: f32[32,1], index: 4, kind: input, shape index: {}]   ;;  %s2171_s5 = inlined_call_operand.vmem [shape: bf16[4,32], index: 5, kind: input, shape index: {}]   ;;  %s2172_s6 = inlined_call_operand.vmem [shape: f32[4,1], index: 6, kind: input, shape index: {}]   ;;  %s2173_s7 = inlined_call_operand.hbm [shape: f32[4,512], index: 7, kind: output, shape index: {}]  }
   0x1   :  { %2178 = sst [smem:[#allocation9_spill]] %s2166_s0 }
   0x2   :  { %12 = vsyncpa [#allocation4], 0 }
   0x3   :  { %14 = vsyncpa [#allocation4 + $0x1], 0  ;;  %s1693_s24 = smov 0   ;;  %s1695_s25 = smov 0  }
   0x4   :  { %s1697_s26 = smov 0   ;;  %s1699_s27 = smov 0  }
   0x5 LB: > { %2179 = sst [smem:[#allocation6_spill]] %s1579_s26  ;;  %s2174_s28 = sadd.s32 4294967295, %s1583_s27   ;;  %s1583_s27 = sphi %s1699_s27, %s2196_s27   ;;  %s1579_s26 = sphi %s1697_s26, %s2198_s26   ;;  %s1575_s25 = sphi %s1695_s25, %s2200_s25   ;;  %s1571_s24 = sphi %s1693_s24, %s2199_s24  }
   0x6   : > { %s1222_s29 = sadd.s32 4294967294, %s1583_s27   ;;  %s1716_s30 = sadd.s32 1, %s1583_s27  }
   0x7   : > { %2180 = sst [smem:[#allocation7_spill]] %s1716_s30  ;;  %s27_s8 = sadd.s32 1, %s1579_s26 }
   0x8   : > { %s24_s9 = ssub.s32 %s1583_s27, %s1716_s30  ;;  %p34_p0 = scmp.ne.s32.totalorder %s1579_s26, %s1575_s25 }
   0x9   : > { %p25_p1 = scmp.eq.s32.totalorder %s24_s9, 0  ;;  %p35_p2 = scmp.eq.s32.totalorder %s1583_s27, 0 }
   0xa   : > { %p190_p3 = scmp.eq.s32.totalorder %s2174_s28, 1  ;;  %p195_p4 = scmp.ne.s32.totalorder %s1575_s25, %s1571_s24 }
   0xb   : > { %s1729_s10 = scalar_select %p25_p1, %s1579_s26, %s27_s8  }
   0xc   : > { %p36_p5 = por %p35_p2, %p34_p0  ;;  %p1731_p6 = por %p190_p3, %p34_p0 }
   0xd   : > { %2181 = sst [smem:[#allocation8_spill]] %s1729_s10  ;;  %p196_p7 = scmp.eq.s32.totalorder %s1222_s29, 1 }
   0xe   : > { %p1224_p9 = scmp.ge.s32.totalorder %s1583_s27, 2 }
   0xf   : > { %p1735_p8 = por %p196_p7, %p195_p4 }
  0x10   : > { %230 = sbr.rel (%p1224_p9) target bundleno = 167 (0xa7), region = 40 }
  0x17   : > { %233 = sbr.rel (!%p36_p5) target bundleno = 167 (0xa7), region = 44  ;;  %s235_s13 = sand.u32 (%p36_p5), 1, %s1579_s26  }
  0x18   : > { %s1226_s14 = sshll.u32 (%p36_p5), %s1583_s27, 1  ;;  %s1225_s15 = sshll.u32 (%p36_p5), %s235_s13, 5 }
  0x19   : > { %s239_s16 = ssub.s32 (%p36_p5), 3, %s1226_s14  ;;  %s1273_s17 = sshll.u32 (%p36_p5), %s1583_s27, 4 }
  0x1a   : > { %p240_p10 = scmp.lt.s32.totalorder (%p36_p5), %s239_s16, 2  ;;  %s2184_s0 = sld [smem:[#allocation9_spill]] (%p36_p5) }
  0x1b   : > { %s1752_s23 = scalar_lea.vmem (%p36_p5), [#allocation2], %s1225_s15  }
  0x1e   : > { %s2202_s16 = smov (!%p240_p10, %s239_s16), 2 }
  0x1f   : > { %s1227_s21 = sshll.u32 %s2202_s16, 8  ;;  %s1750_s22 = sshll.u32 %s2202_s16, 3 }
  0x20   : > { %s1748_s20 = scalar_lea.vmem %s2184_s0, %s1273_s17   ;;  %p1231_p11 = scmp.eq.s32.totalorder %s1227_s21, 0 }
  0x21   : > { %p250_p12 = scmp.lt.u32.totalorder (!%p1231_p11), %s1750_s22, 8 }
  0x22   : > { %249 = sbr.rel (%p1231_p11) target bundleno = 167 (0xa7), region = 48 }
  0x29   : > { %253 = sbr.rel (%p250_p12) target bundleno = 158 (0x9e), region = 52  ;;  %s1756_s29 = sand.u32 (!%p250_p12), 7, %s1750_s22  }
  0x2a   : > { %p271_p13 = scmp.eq.s32.totalorder (!%p250_p12), %s1756_s29, 0  ;;  %p1232_p0 = scmp.ne.s32.totalorder (!%p250_p12), %s1756_s29, 0 }
  0x30   : > { %274 = sbr.rel (%p1232_p0) target bundleno = 101 (0x65), region = 67  ;;  %s275_s8 = sshrl.u32 (!%p1232_p0), %s1750_s22, 3 }
  0x31   : > { %s1763_s9 = sshrl.u32 (!%p1232_p0), %s275_s8, 5 }
  0x32   : > { %p1233_p1 = scmp.le.s32.totalorder (!%p1232_p0), %s1763_s9, 0 }
  0x37   : > { %1150 = sbr.rel (%p1233_p1) target bundleno = 81 (0x51), region = 166  ;;  %s2185_s13 = smov (!%p1233_p1), %s1752_s23 }
  0x38   : > { %s2186_s14 = smov (!%p1233_p1), %s1748_s20  ;;  %s1772_s15 = smov (!%p1233_p1), 0  }
  0x39   : > { %s1774_s16 = smov (!%p1233_p1), 0  }
  0x3e LB: >> { %v294_v0 = vld [vmem:[%s1591_s14 + $0x18] sm:$0xff]  ;;  %v296_v1 = vld [vmem:[%s1591_s14 + $0x20] sm:$0xff]  ;;  %v298_v2 = vld [vmem:[%s1591_s14 + $0x28] sm:$0xff]  ;;  %s416_s17 = sadd.s32 1, %s1595_s15  ;;  %s282_s16 = sadd.s32 1, %s1599_s16   ;;  %s1599_s16 = sphi %s1774_s16, %s282_s16   ;;  %s1595_s15 = sphi %s1772_s15, %s2189_s15   ;;  %s1591_s14 = sphi %s2186_s14, %s2188_s14   ;;  %s1587_s13 = sphi %s2185_s13, %s2187_s13  }
  0x3f   : >> { %v300_v3 = vld [vmem:[%s1591_s14 + $0x30] sm:$0xff]  ;;  %v302_v4 = vld [vmem:[%s1591_s14 + $0x38] sm:$0xff]  ;;  %v304_v5 = vld [vmem:[%s1591_s14 + $0x40] sm:$0xff]  ;;  %353 = vst [vmem:[%s1587_s13 + $0x10] sm:$0xff] %v294_v0  ;;  %p417_p2 = scmp.ge.s32.totalorder %s416_s17, %s1763_s9  ;;  %p281_p3 = scmp.ge.s32.totalorder %s282_s16, %s1763_s9 }
  0x40   : >> { %355 = vst [vmem:[%s1587_s13 + $0x18] sm:$0xff] %v296_v1  ;;  %357 = vst [vmem:[%s1587_s13 + $0x20] sm:$0xff] %v298_v2  ;;  %v306_v6 = vld [vmem:[%s1591_s14 + $0x48] sm:$0xff]  ;;  %v308_v7 = vld [vmem:[%s1591_s14 + $0x50] sm:$0xff] }
  0x41   : >> { %v310_v8 = vld [vmem:[%s1591_s14 + $0x58] sm:$0xff]  ;;  %359 = vst [vmem:[%s1587_s13 + $0x28] sm:$0xff] %v300_v3  ;;  %361 = vst [vmem:[%s1587_s13 + $0x30] sm:$0xff] %v302_v4  ;;  %v312_v9 = vld [vmem:[%s1591_s14 + $0x60] sm:$0xff]  ;;  %s2204_s17 = smov (%p417_p2, %s416_s17), 0 }
  0x42   : >> { %363 = vst [vmem:[%s1587_s13 + $0x38] sm:$0xff] %v304_v5  ;;  %v314_v10 = vld [vmem:[%s1591_s14 + $0x68] sm:$0xff]  ;;  %v316_v11 = vld [vmem:[%s1591_s14 + $0x70] sm:$0xff]  ;;  %365 = vst [vmem:[%s1587_s13 + $0x40] sm:$0xff] %v306_v6  ;;  %s1234_s18 = sshll.u32 %s2204_s17, 8  ;;  %s2189_s15 = smov %s2204_s17 }
  0x43   : >> { %367 = vst [vmem:[%s1587_s13 + $0x48] sm:$0xff] %v308_v7  ;;  %369 = vst [vmem:[%s1587_s13 + $0x50] sm:$0xff] %v310_v8  ;;  %v318_v12 = vld [vmem:[%s1591_s14 + $0x78] sm:$0xff]  ;;  %v320_v13 = vld [vmem:[%s1591_s14 + $0x80] sm:$0xff]  ;;  %s421_s19 = scalar_lea.vmem %s1748_s20, %s1234_s18   ;;  %s422_s21 = scalar_lea.vmem %s1752_s23, %s1234_s18 [#allocation2]  }
  0x44   : >> { %v322_v14 = vld [vmem:[%s1591_s14 + $0x88] sm:$0xff]  ;;  %371 = vst [vmem:[%s1587_s13 + $0x58] sm:$0xff] %v312_v9  ;;  %373 = vst [vmem:[%s1587_s13 + $0x60] sm:$0xff] %v314_v10  ;;  %v324_v15 = vld [vmem:[%s1591_s14 + $0x90] sm:$0xff] }
  0x45   : >> { %375 = vst [vmem:[%s1587_s13 + $0x68] sm:$0xff] %v316_v11  ;;  %v326_v16 = vld [vmem:[%s1591_s14 + $0x98] sm:$0xff]  ;;  %v328_v17 = vld [vmem:[%s1591_s14 + $0xa0] sm:$0xff]  ;;  %377 = vst [vmem:[%s1587_s13 + $0x70] sm:$0xff] %v318_v12 }
  0x46   : >> { %379 = vst [vmem:[%s1587_s13 + $0x78] sm:$0xff] %v320_v13  ;;  %381 = vst [vmem:[%s1587_s13 + $0x80] sm:$0xff] %v322_v14  ;;  %v330_v18 = vld [vmem:[%s1591_s14 + $0xa8] sm:$0xff]  ;;  %v332_v19 = vld [vmem:[%s1591_s14 + $0xb0] sm:$0xff] }
  0x47   : >> { %v334_v20 = vld [vmem:[%s1591_s14 + $0xb8] sm:$0xff]  ;;  %383 = vst [vmem:[%s1587_s13 + $0x88] sm:$0xff] %v324_v15  ;;  %385 = vst [vmem:[%s1587_s13 + $0x90] sm:$0xff] %v326_v16  ;;  %v336_v21 = vld [vmem:[%s1591_s14 + $0xc0] sm:$0xff] }
  0x48   : >> { %387 = vst [vmem:[%s1587_s13 + $0x98] sm:$0xff] %v328_v17  ;;  %v338_v22 = vld [vmem:[%s1591_s14 + $0xc8] sm:$0xff]  ;;  %v340_v23 = vld [vmem:[%s1591_s14 + $0xd0] sm:$0xff]  ;;  %389 = vst [vmem:[%s1587_s13 + $0xa0] sm:$0xff] %v330_v18 }
  0x49   : >> { %391 = vst [vmem:[%s1587_s13 + $0xa8] sm:$0xff] %v332_v19  ;;  %393 = vst [vmem:[%s1587_s13 + $0xb0] sm:$0xff] %v334_v20  ;;  %v342_v24 = vld [vmem:[%s1591_s14 + $0xd8] sm:$0xff]  ;;  %v344_v25 = vld [vmem:[%s1591_s14 + $0xe0] sm:$0xff] }
  0x4a   : >> { %v346_v26 = vld [vmem:[%s1591_s14 + $0xe8] sm:$0xff]  ;;  %395 = vst [vmem:[%s1587_s13 + $0xb8] sm:$0xff] %v336_v21  ;;  %397 = vst [vmem:[%s1587_s13 + $0xc0] sm:$0xff] %v338_v22  ;;  %v348_v27 = vld [vmem:[%s1591_s14 + $0xf0] sm:$0xff]  ;;  %284 = sbr.rel (!%p281_p3) target bundleno = 62 (0x3e), region = 172 }
  0x4b   : >> { %399 = vst [vmem:[%s1587_s13 + $0xc8] sm:$0xff] %v340_v23  ;;  %v350_v28 = vld [vmem:[%s1591_s14 + $0xf8] sm:$0xff]  ;;  %v288_v29 = vld [vmem:[%s1591_s14] sm:$0xff]  ;;  %401 = vst [vmem:[%s1587_s13 + $0xd0] sm:$0xff] %v342_v24 }
  0x4c   : >> { %403 = vst [vmem:[%s1587_s13 + $0xd8] sm:$0xff] %v344_v25  ;;  %405 = vst [vmem:[%s1587_s13 + $0xe0] sm:$0xff] %v346_v26  ;;  %v290_v30 = vld [vmem:[%s1591_s14 + $0x8] sm:$0xff]  ;;  %v410_v31 = vld [vmem:[%s1591_s14 + $0x100] sm:$0xff] }
  0x4d   : >> { %289 = vst [vmem:[%s1587_s13] sm:$0xff] %v288_v29  ;;  %407 = vst [vmem:[%s1587_s13 + $0xe8] sm:$0xff] %v348_v27  ;;  %v412_v32 = vld [vmem:[%s1591_s14 + $0x108] sm:$0xff]  ;;  %v414_v33 = vld [vmem:[%s1591_s14 + $0x110] sm:$0xff]  ;;  %s2188_s14 = smov %s421_s19 }
  0x4e   : >> { %409 = vst [vmem:[%s1587_s13 + $0xf0] sm:$0xff] %v350_v28  ;;  %291 = vst [vmem:[%s1587_s13 + $0x8] sm:$0xff] %v290_v30 }
  0x4f   : >> { %411 = vst [vmem:[%s1587_s13 + $0xf8] sm:$0xff] %v410_v31  ;;  %413 = vst [vmem:[%s1587_s13 + $0x100] sm:$0xff] %v412_v32 }
  0x50   : >> { %415 = vst [vmem:[%s1587_s13 + $0x108] sm:$0xff] %v414_v33  ;;  %s2187_s13 = smov %s422_s21 }
  0x51 PF: > { %s1876_s18 = sand.u32 31, %s275_s8   ;;  %s1274_s28 = sshll.u32 %s1763_s9, 12 }
  0x52   : > { %s427_s0 = sshra.s32 %s1274_s28, 4  ;;  %p1239_p4 = scmp.le.s32.totalorder %s1876_s18, 0 }
  0x53   : > { %s1880_s10 = scalar_lea.vmem %s1748_s20, %s427_s0   ;;  %s431_s21 = scalar_lea.vmem %s1752_s23, %s427_s0 [#allocation2]  }
  0x54   : > { %1164 = sbr.rel (%p1239_p4) target bundleno = 101 (0x65), region = 177  ;;  %s1601_s17 = smov (!%p1239_p4), %s431_s21  }
  0x55   : > { %s1605_s16 = smov (!%p1239_p4), %s1880_s10   ;;  %s1609_s19 = smov (!%p1239_p4), 0  }
  0x56   : > { %s1613_s13 = smov (!%p1239_p4), 0  }
  0x5b LB: >> { %v443_v34 = vld [vmem:[%s1607_s16] sm:$0xff]  ;;  %v445_v35 = vld [vmem:[%s1607_s16 + $0x18] sm:$0xff]  ;;  %s447_s28 = sadd.s32 1, %s1611_s19  ;;  %s437_s13 = sadd.s32 1, %s1615_s13   ;;  %s1615_s13 = sphi %s1613_s13, %s437_s13   ;;  %s1611_s19 = sphi %s1609_s19, %s1610_s19   ;;  %s1607_s16 = sphi %s1605_s16, %s452_s16   ;;  %s1603_s17 = sphi %s1601_s17, %s453_s17  }
  0x5c   : >> { %444 = vst [vmem:[%s1603_s17] sm:$0xff] %v443_v34  ;;  %446 = vst [vmem:[%s1603_s17 + $0x10] sm:$0xff] %v445_v35  ;;  %p448_p5 = scmp.ge.s32.totalorder %s447_s28, %s1876_s18  ;;  %p436_p7 = scmp.ge.s32.totalorder %s437_s13, %s1876_s18 }
  0x5e   : >> { %s2206_s28 = smov (%p448_p5, %s447_s28), 0  ;;  %439 = sbr.rel (!%p436_p7) target bundleno = 91 (0x5b), region = 183 }
  0x5f   : >> { %s1240_s0 = sshll.u32 %s2206_s28, 3  ;;  %s1610_s19 = smov %s2206_s28  }
  0x60   : >> { %s452_s16 = scalar_lea.vmem %s1880_s10, %s1240_s0   ;;  %s453_s17 = scalar_lea.vmem %s431_s21, %s1240_s0 [#allocation2]  }
  0x65 PF: > { %456 = sbr.rel (%p271_p13) target bundleno = 158 (0x9e), region = 85  ;;  %s458_s8 = ssub.s32 (!%p271_p13), %s1750_s22, %s1756_s29 }
  0x66   : > { %s462_s9 = sshrl.u32 (!%p271_p13), %s1750_s22, 3  ;;  %s1894_s14 = scalar_lea.vmem (!%p271_p13), %s1748_s20, %s458_s8 }
  0x67   : > { %s1897_s15 = scalar_lea.vmem (!%p271_p13), %s1752_s23, %s458_s8 [#allocation2]  ;;  %s1901_s17 = sshrl.u32 (!%p271_p13), %s462_s9, 5 }
  0x68   : > { %p1242_p10 = scmp.le.s32.totalorder (!%p271_p13), %s1901_s17, 0 }
  0x6c   : > { %1178 = sbr.rel (%p1242_p10) target bundleno = 134 (0x86), region = 188  ;;  %s2190_s10 = smov (!%p1242_p10), %s1752_s23 }
  0x6d   : > { %s2191_s18 = smov (!%p1242_p10), %s1748_s20  ;;  %s1910_s21 = smov (!%p1242_p10), 0  }
  0x6e   : > { %s1912_s16 = smov (!%p1242_p10), 0  }
  0x73 LB: >> { %v481_v36 = vld [vmem:[%s1623_s18 + $0x18] sm:$0xff]  ;;  %v483_v37 = vld [vmem:[%s1623_s18 + $0x20] sm:$0xff]  ;;  %v485_v38 = vld [vmem:[%s1623_s18 + $0x28] sm:$0xff]  ;;  %s603_s19 = sadd.s32 1, %s1627_s21  ;;  %s469_s16 = sadd.s32 1, %s1631_s16   ;;  %s1631_s16 = sphi %s1912_s16, %s469_s16   ;;  %s1627_s21 = sphi %s1910_s21, %s2194_s21   ;;  %s1623_s18 = sphi %s2191_s18, %s2193_s18   ;;  %s1619_s10 = sphi %s2190_s10, %s2192_s10  }
  0x74   : >> { %v487_v39 = vld [vmem:[%s1623_s18 + $0x30] sm:$0xff]  ;;  %v489_v40 = vld [vmem:[%s1623_s18 + $0x38] sm:$0xff]  ;;  %v491_v41 = vld [vmem:[%s1623_s18 + $0x40] sm:$0xff]  ;;  %540 = vst [vmem:[%s1619_s10 + $0x10] sm:$0xff] %v481_v36  ;;  %p604_p11 = scmp.ge.s32.totalorder %s603_s19, %s1901_s17  ;;  %p468_p12 = scmp.ge.s32.totalorder %s469_s16, %s1901_s17 }
  0x75   : >> { %542 = vst [vmem:[%s1619_s10 + $0x18] sm:$0xff] %v483_v37  ;;  %544 = vst [vmem:[%s1619_s10 + $0x20] sm:$0xff] %v485_v38  ;;  %v493_v42 = vld [vmem:[%s1623_s18 + $0x48] sm:$0xff]  ;;  %v495_v43 = vld [vmem:[%s1623_s18 + $0x50] sm:$0xff] }
  0x76   : >> { %v497_v44 = vld [vmem:[%s1623_s18 + $0x58] sm:$0xff]  ;;  %546 = vst [vmem:[%s1619_s10 + $0x28] sm:$0xff] %v487_v39  ;;  %548 = vst [vmem:[%s1619_s10 + $0x30] sm:$0xff] %v489_v40  ;;  %v499_v45 = vld [vmem:[%s1623_s18 + $0x60] sm:$0xff]  ;;  %s2208_s19 = smov (%p604_p11, %s603_s19), 0 }
  0x77   : >> { %550 = vst [vmem:[%s1619_s10 + $0x38] sm:$0xff] %v491_v41  ;;  %v501_v46 = vld [vmem:[%s1623_s18 + $0x68] sm:$0xff]  ;;  %v503_v47 = vld [vmem:[%s1623_s18 + $0x70] sm:$0xff]  ;;  %552 = vst [vmem:[%s1619_s10 + $0x40] sm:$0xff] %v493_v42  ;;  %s1243_s13 = sshll.u32 %s2208_s19, 8  ;;  %s2194_s21 = smov %s2208_s19 }
  0x78   : >> { %554 = vst [vmem:[%s1619_s10 + $0x48] sm:$0xff] %v495_v43  ;;  %556 = vst [vmem:[%s1619_s10 + $0x50] sm:$0xff] %v497_v44  ;;  %v505_v48 = vld [vmem:[%s1623_s18 + $0x78] sm:$0xff]  ;;  %v507_v49 = vld [vmem:[%s1623_s18 + $0x80] sm:$0xff]  ;;  %s608_s28 = scalar_lea.vmem %s1748_s20, %s1243_s13   ;;  %s609_s0 = scalar_lea.vmem %s1752_s23, %s1243_s13 [#allocation2]  }
  0x79   : >> { %v509_v50 = vld [vmem:[%s1623_s18 + $0x88] sm:$0xff]  ;;  %558 = vst [vmem:[%s1619_s10 + $0x58] sm:$0xff] %v499_v45  ;;  %560 = vst [vmem:[%s1619_s10 + $0x60] sm:$0xff] %v501_v46  ;;  %v511_v51 = vld [vmem:[%s1623_s18 + $0x90] sm:$0xff] }
  0x7a   : >> { %562 = vst [vmem:[%s1619_s10 + $0x68] sm:$0xff] %v503_v47  ;;  %v513_v52 = vld [vmem:[%s1623_s18 + $0x98] sm:$0xff]  ;;  %v515_v53 = vld [vmem:[%s1623_s18 + $0xa0] sm:$0xff]  ;;  %564 = vst [vmem:[%s1619_s10 + $0x70] sm:$0xff] %v505_v48 }
  0x7b   : >> { %566 = vst [vmem:[%s1619_s10 + $0x78] sm:$0xff] %v507_v49  ;;  %568 = vst [vmem:[%s1619_s10 + $0x80] sm:$0xff] %v509_v50  ;;  %v517_v54 = vld [vmem:[%s1623_s18 + $0xa8] sm:$0xff]  ;;  %v519_v55 = vld [vmem:[%s1623_s18 + $0xb0] sm:$0xff] }
  0x7c   : >> { %v521_v56 = vld [vmem:[%s1623_s18 + $0xb8] sm:$0xff]  ;;  %570 = vst [vmem:[%s1619_s10 + $0x88] sm:$0xff] %v511_v51  ;;  %572 = vst [vmem:[%s1619_s10 + $0x90] sm:$0xff] %v513_v52  ;;  %v523_v57 = vld [vmem:[%s1623_s18 + $0xc0] sm:$0xff] }
  0x7d   : >> { %574 = vst [vmem:[%s1619_s10 + $0x98] sm:$0xff] %v515_v53  ;;  %v525_v58 = vld [vmem:[%s1623_s18 + $0xc8] sm:$0xff]  ;;  %v527_v59 = vld [vmem:[%s1623_s18 + $0xd0] sm:$0xff]  ;;  %576 = vst [vmem:[%s1619_s10 + $0xa0] sm:$0xff] %v517_v54 }
  0x7e   : >> { %578 = vst [vmem:[%s1619_s10 + $0xa8] sm:$0xff] %v519_v55  ;;  %580 = vst [vmem:[%s1619_s10 + $0xb0] sm:$0xff] %v521_v56  ;;  %v529_v60 = vld [vmem:[%s1623_s18 + $0xd8] sm:$0xff]  ;;  %v531_v61 = vld [vmem:[%s1623_s18 + $0xe0] sm:$0xff] }
  0x7f   : >> { %v533_v62 = vld [vmem:[%s1623_s18 + $0xe8] sm:$0xff]  ;;  %582 = vst [vmem:[%s1619_s10 + $0xb8] sm:$0xff] %v523_v57  ;;  %584 = vst [vmem:[%s1619_s10 + $0xc0] sm:$0xff] %v525_v58  ;;  %v535_v63 = vld [vmem:[%s1623_s18 + $0xf0] sm:$0xff]  ;;  %471 = sbr.rel (!%p468_p12) target bundleno = 115 (0x73), region = 194 }
  0x80   : >> { %586 = vst [vmem:[%s1619_s10 + $0xc8] sm:$0xff] %v527_v59  ;;  %v537_v0 = vld [vmem:[%s1623_s18 + $0xf8] sm:$0xff]  ;;  %v475_v1 = vld [vmem:[%s1623_s18] sm:$0xff]  ;;  %588 = vst [vmem:[%s1619_s10 + $0xd0] sm:$0xff] %v529_v60 }
  0x81   : >> { %590 = vst [vmem:[%s1619_s10 + $0xd8] sm:$0xff] %v531_v61  ;;  %592 = vst [vmem:[%s1619_s10 + $0xe0] sm:$0xff] %v533_v62  ;;  %v477_v2 = vld [vmem:[%s1623_s18 + $0x8] sm:$0xff]  ;;  %v597_v3 = vld [vmem:[%s1623_s18 + $0x100] sm:$0xff] }
  0x82   : >> { %476 = vst [vmem:[%s1619_s10] sm:$0xff] %v475_v1  ;;  %594 = vst [vmem:[%s1619_s10 + $0xe8] sm:$0xff] %v535_v63  ;;  %v599_v4 = vld [vmem:[%s1623_s18 + $0x108] sm:$0xff]  ;;  %v601_v5 = vld [vmem:[%s1623_s18 + $0x110] sm:$0xff]  ;;  %s2193_s18 = smov %s608_s28 }
  0x83   : >> { %596 = vst [vmem:[%s1619_s10 + $0xf0] sm:$0xff] %v537_v0  ;;  %478 = vst [vmem:[%s1619_s10 + $0x8] sm:$0xff] %v477_v2 }
  0x84   : >> { %598 = vst [vmem:[%s1619_s10 + $0xf8] sm:$0xff] %v597_v3  ;;  %600 = vst [vmem:[%s1619_s10 + $0x100] sm:$0xff] %v599_v4 }
  0x85   : >> { %602 = vst [vmem:[%s1619_s10 + $0x108] sm:$0xff] %v601_v5  ;;  %s2192_s10 = smov %s609_s0 }
  0x86 PF: > { %s2014_s8 = sand.u32 31, %s462_s9   ;;  %s1276_s13 = sshll.u32 %s1901_s17, 12 }
  0x87   : > { %s614_s26 = sshra.s32 %s1276_s13, 4  ;;  %p1248_p13 = scmp.le.s32.totalorder %s2014_s8, 0 }
  0x88   : > { %s2018_s30 = scalar_lea.vmem %s1748_s20, %s614_s26   ;;  %s618_s0 = scalar_lea.vmem %s1752_s23, %s614_s26 [#allocation2]  }
  0x89   : > { %1192 = sbr.rel (%p1248_p13) target bundleno = 154 (0x9a), region = 199  ;;  %s1633_s19 = smov (!%p1248_p13), %s618_s0  }
  0x8a   : > { %s1637_s16 = smov (!%p1248_p13), %s2018_s30   ;;  %s1641_s28 = smov (!%p1248_p13), 0  }
  0x8b   : > { %s1645_s10 = smov (!%p1248_p13), 0  }
  0x90 LB: >> { %v630_v6 = vld [vmem:[%s1639_s16] sm:$0xff]  ;;  %v632_v7 = vld [vmem:[%s1639_s16 + $0x18] sm:$0xff]  ;;  %s634_s9 = sadd.s32 1, %s1643_s28  ;;  %s624_s10 = sadd.s32 1, %s1647_s10   ;;  %s1647_s10 = sphi %s1645_s10, %s624_s10   ;;  %s1643_s28 = sphi %s1641_s28, %s1642_s28   ;;  %s1639_s16 = sphi %s1637_s16, %s639_s16   ;;  %s1635_s19 = sphi %s1633_s19, %s640_s19  }
  0x91   : >> { %631 = vst [vmem:[%s1635_s19] sm:$0xff] %v630_v6  ;;  %633 = vst [vmem:[%s1635_s19 + $0x10] sm:$0xff] %v632_v7  ;;  %p635_p0 = scmp.ge.s32.totalorder %s634_s9, %s2014_s8  ;;  %p623_p1 = scmp.ge.s32.totalorder %s624_s10, %s2014_s8 }
  0x93   : >> { %s2210_s9 = smov (%p635_p0, %s634_s9), 0  ;;  %626 = sbr.rel (!%p623_p1) target bundleno = 144 (0x90), region = 205 }
  0x94   : >> { %s1249_s26 = sshll.u32 %s2210_s9, 3  ;;  %s1642_s28 = smov %s2210_s9  }
  0x95   : >> { %s639_s16 = scalar_lea.vmem %s2018_s30, %s1249_s26   ;;  %s640_s19 = scalar_lea.vmem %s618_s0, %s1249_s26 [#allocation2]  }
  0x9a PF: > { %s1649_s17 = smov 0  }
  0x9b   : > { %s641_s18 = sshllo.u32 %s1649_s17, %s1756_s29 }
  0x9c   : > { %v650_v8 = vld [vmem:[%s1894_s14] sm:%s641_s18]  ;;  %v652_v9 = vld [vmem:[%s1894_s14 + $0x18] sm:%s641_s18] }
  0x9d   : > { %651 = vst [vmem:[%s1897_s15] sm:%s641_s18] %v650_v8  ;;  %653 = vst [vmem:[%s1897_s15 + $0x10] sm:%s641_s18] %v652_v9 }
  0x9e PF: > { %p1251_p2 = scmp.ge.u32.totalorder %s1750_s22, 8 }
  0x9f   : > { %s1650_s21 = smov (!%p1251_p2), 0  }
  0xa0   : > { %256 = sbr.rel (%p1251_p2) target bundleno = 167 (0xa7), region = 56  ;;  %s257_s30 = sshllo.u32 (!%p1251_p2), %s1650_s21, %s1750_s22 }
  0xa1   : > { %v266_v10 = vld [vmem:[%s1748_s20] sm:%s257_s30] (!%p1251_p2)  ;;  %v268_v11 = vld [vmem:[%s1748_s20 + $0x18] sm:%s257_s30] (!%p1251_p2) }
  0xa2   : > { %267 = vst [vmem:[%s1752_s23] sm:%s257_s30] (!%p1251_p2), %v266_v10  ;;  %269 = vst [vmem:[%s1752_s23 + $0x10] sm:%s257_s30] (!%p1251_p2), %v268_v11 }
  0xa7 PF: > { %p1252_p3 = scmp.ge.s32.totalorder %s1583_s27, 1  ;;  %p656_p4 = scmp.lt.s32.totalorder %s1583_s27, 3 }
  0xa9   : > { %p657_p5 = pnand %p1252_p3, %p656_p4 }
  0xaa   : > { %s2040_s29 = sand.u32 (!%p657_p5), 1, %s1575_s25   ;;  %v1651_v12 = vmov (!%p657_p5), 0   ;;  %v715_v19 = vld [vmem:[%s2168_s2] sm:$0xff] (!%p657_p5)  ;;  %v717_v21 = vld [vmem:[%s2168_s2 + $0x10] sm:$0xff] (!%p657_p5)  ;;  %vm783_vm0 = vcmask (!%p657_p5), 130048   ;;  %v716_v22 = vld [vmem:[%s2168_s2 + $0x8] sm:$0xff] (!%p657_p5) }
  0xab   : > { %660 = sbr.rel (%p657_p5) target bundleno = 893 (0x37d), region = 110  ;;  %s1253_s14 = sshll.u32 (!%p657_p5), %s2040_s29, 5  ;;  %828 = vmatprep.mubr.bf16.mxu0 (!%p657_p5), %v1651_v12  ;;  %1449 = vset.pattern.permute.xlu0 (!%p657_p5), %v1651_v12  ;;  %v1451_v20 = vld [vmem:[%s2167_s1] sm:$0xff] (!%p657_p5)   ;;  %v718_v23 = vld [vmem:[%s2168_s2 + $0x18] sm:$0xff] (!%p657_p5)  ;;  %v720_v25 = vld [vmem:[%s2168_s2 + $0x28] sm:$0xff] (!%p657_p5)  ;;  %vm931_vm1 = vcmask (!%p657_p5), 523264  }
  0xac   : > { %1450 = vset.pattern.permute.xlu1 (!%p657_p5), %v1651_v12  ;;  %970 = vmatprep.mubr.bf16.mxu1 (!%p657_p5), %v1651_v12  ;;  %s665_s20 = scalar_lea.vmem (!%p657_p5), [#allocation2], %s1253_s14  ;;  %v719_v24 = vld [vmem:[%s2168_s2 + $0x20] sm:$0xff] (!%p657_p5)  ;;  %v1452_v26 = vld [vmem:[%s2167_s1 + $0x8] sm:$0xff] (!%p657_p5)   ;;  %v721_v27 = vld [vmem:[%s2168_s2 + $0x30] sm:$0xff] (!%p657_p5)  ;;  %vm1010_vm2 = vcmask (!%p657_p5), 261120   ;;  %s1254_s13 = sshll.u32 (!%p657_p5), %s2040_s29, 3 }
  0xad   : > { %v702_v13 = vld [vmem:[%s665_s20 + $0x8] sm:$0xff] (!%p657_p5)  ;;  %v704_v14 = vld [vmem:[%s665_s20 + $0x18] sm:$0xff] (!%p657_p5)  ;;  %v701_v15 = vld [vmem:[%s665_s20] sm:$0xff] (!%p657_p5)  ;;  %725 = vperm.xlu0 (!%p657_p5), %1449, %v715_v19   ;;  %735 = vperm.xlu1 (!%p657_p5), %1450, %v717_v21   ;;  %s2195_s0 = sadd.s32 (!%p657_p5), 4294967295, %s1583_s27   ;;  %s693_s16 = scalar_lea.vmem (!%p657_p5), [#allocation3], %s1254_s13 }
  0xae   : > { %v706_v16 = vpack.c.bf16 (!%p657_p5), %v704_v14, %v702_v13  ;;  %v703_v17 = vld [vmem:[%s665_s20 + $0x10] sm:$0xff] (!%p657_p5)  ;;  %v722_v28 = vld [vmem:[%s2168_s2 + $0x38] sm:$0xff] (!%p657_p5)  ;;  %v897_v29 = vld [vmem:[%s2170_s4] sm:$0xff] (!%p657_p5)  ;;  %s1278_s19 = sshll.u32 (!%p657_p5), %s2195_s0, 7  ;;  %s1075_s28 = sshll.u32 (!%p657_p5), %s693_s16, 4  ;;  %s2124_s28 = int_to_ptr.vmem [resolvable:$true] %s1075_s28 }
  0xaf   : > { %v705_v18 = vpack.c.bf16 (!%p657_p5), %v703_v17, %v701_v15  ;;  %v898_v30 = vld [vmem:[%s2170_s4 + $0x8] sm:$0xff] (!%p657_p5)  ;;  %v1453_v31 = vld [vmem:[%s2167_s1 + $0x10] sm:$0xff] (!%p657_p5)   ;;  %v900_v33 = vld [vmem:[%s2170_s4 + $0x18] sm:$0xff] (!%p657_p5)  ;;  %s2122_s26 = scalar_lea.hbm (!%p657_p5), %s2173_s7, %s1278_s19  ;;  %s1061_s17 = scalar_lea.sflag (!%p657_p5), [#allocation4], %s2040_s29 }
  0xb0   : > { %796 = vmatprep.subr.bf16.mxu0 (!%p657_p5), %v706_v16  ;;  %v899_v32 = vld [vmem:[%s2170_s4 + $0x10] sm:$0xff] (!%p657_p5)  ;;  %v1004_v34 = vld [vmem:[%s2172_s6] sm:$0xf] (!%p657_p5)  ;;  %v1454_v35 = vld [vmem:[%s2167_s1 + $0x18] sm:$0xff] (!%p657_p5)   ;;  %s1457_s18 = scalar_lea.vmem (!%p657_p5), %s2124_s28, 128  ;;  %s1652_s21 = smov (!%p657_p5), [#allocation3]  }
  0xb1   : > { %797 = vmatpush1.bf16.msra.mxu0 (!%p657_p5), %v705_v18  ;;  %730 = vperm.xlu0 (!%p657_p5), %1449, %v716_v22   ;;  %p1458_p7 = scmp.ne.s32.totalorder (!%p657_p5), %s2124_s28, %s1457_s18  ;;  %s1461_s30 = sshll.u32 (!%p657_p5), %s1652_s21, 4  ;;  %s1462_s30 = int_to_ptr.vmem [resolvable:$false] %s1461_s30 }
  0xb2   : > { %740 = vperm.xlu1 %1450, %v718_v23   ;;  %s1463_s14 = scalar_lea.vmem %s1462_s30, 256  ;;  %p1464_p12 = scmp.lt.s32.totalorder %s2124_s28, %s1462_s30 }
  0xb3   : > { %p1459_p10 = pnand %p1458_p7, %p1731_p6  ;;  %p1465_p13 = scmp.lt.s32.totalorder %s1463_s14, %s1457_s18 }
  0xb4   : > { %1259 = vmatmul.mubr.msk.bf16.vlgmr.msra.gmra.mrb[0].mxu0 %vm783_vm0, %v1451_v20 }
  0xb5   : > { %838 = vmatprep.mubr.bf16.mxu0 %v1651_v12  ;;  %745 = vperm.xlu0 %1449, %v719_v24   ;;  %p1460_p11 = pneg %p1459_p10  ;;  %p1466_p0 = por %p1465_p13, %p1464_p12 }
  0xb6   : > { %750 = vperm.xlu1 %1450, %v720_v25  }
  0xb7   : > { %p1467_p1 = pnand %p1466_p0, %p1460_p11 }
  0xb9   : > { %755 = vperm.xlu0 %1449, %v721_v27  }
  0xba   : > { %760 = vperm.xlu1 %1450, %v722_v28  }
  0xbc   : > { %1260 = vmatmul.mubr.msk.bf16.gmra.mrb[4].mxu0 %vm783_vm0, %v1452_v26 }
  0xbd   : > { %848 = vmatprep.mubr.bf16.mxu0 %v1651_v12  ;;  %903 = vperm.xlu0 %1449, %v897_v29  }
  0xbe   : > { %908 = vperm.xlu1 %1450, %v898_v30  }
  0xc1   : > { %913 = vperm.xlu0 %1449, %v899_v32  }
  0xc2   : > { %918 = vperm.xlu1 %1450, %v900_v33  }
  0xc4   : > { %1261 = vmatmul.mubr.msk.bf16.gmra.mrb[8].mxu0 %vm783_vm0, %v1453_v31 }
  0xc5   : > { %858 = vmatprep.mubr.bf16.mxu0 %v1651_v12  ;;  %1007 = vperm.xlu0 %1449, %v1004_v34  }
  0xcc   : > { %1262 = vmatmul.mubr.msk.bf16.gmra.mrb[12].mxu0 %vm783_vm0, %v1454_v35 }
 0x12c   : > { %v726_v36 = vpop.permute.xlu0 %725  ;;  %v736_v45 = vpop.permute.xlu1 %735 }
 0x130   : > { %v731_v40 = vpop.permute.xlu0 %730 }
 0x131   : > { %v741_v56 = vpop.permute.xlu1 %740 }
 0x134   : > { %v746_v3 = vpop.permute.xlu0 %745 }
 0x135   : > { %v751_v8 = vpop.permute.xlu1 %750 }
 0x138   : > { %v756_v20 = vpop.permute.xlu0 %755 }
 0x139   : > { %v761_v25 = vpop.permute.xlu1 %760 }
 0x187   : > { %v830_v37 = vpop.f32.mrb[0].mxu0 }
 0x188   : > { %v831_v38 = vadd.f32 %v830_v37, %v726_v36  ;;  %v832_v39 = vpop.f32.mrb[1].mxu0  ;;  %v1455_v37 = vld [vmem:[%s2169_s3] sm:$0xff]  }
 0x189   : > { %v833_v41 = vadd.f32 %v832_v39, %v726_v36  ;;  %v834_v42 = vpop.f32.mrb[2].mxu0  ;;  %v904_v39 = vpop.permute.xlu0 %903 }
 0x18a   : > { %v835_v43 = vadd.f32 %v834_v42, %v731_v40  ;;  %v836_v44 = vpop.f32.mrb[3].mxu0  ;;  %v869_v47 = vmax.f32 %v831_v38, 0.0  ;;  %v1456_v38 = vld [vmem:[%s2169_s3 + $0x8] sm:$0xff]  }
 0x18b   : > { %v837_v46 = vadd.f32 %v836_v44, %v731_v40  ;;  %v870_v49 = vmax.f32 %v833_v41, 0.0 }
 0x18c   : > { %v871_v48 = vmax.f32 %v835_v43, 0.0  ;;  %v909_v43 = vpop.permute.xlu1 %908 }
 0x18d   : > { %v872_v50 = vmax.f32 %v837_v46, 0.0 }
 0x18e   : > { %v889_v51 = vpack.c.bf16 %v871_v48, %v869_v47 }
 0x18f   : > { %v840_v52 = vpop.f32.mrb[4].mxu0  ;;  %v890_v53 = vpack.c.bf16 %v872_v50, %v870_v49 }
 0x190   : > { %v841_v54 = vadd.f32 %v840_v52, %v736_v45  ;;  %v842_v55 = vpop.f32.mrb[5].mxu0 }
 0x191   : > { %v843_v57 = vadd.f32 %v842_v55, %v736_v45  ;;  %v844_v58 = vpop.f32.mrb[6].mxu0  ;;  %938 = vmatprep.subr.bf16.mxu1 %v890_v53 }
 0x192   : > { %v845_v59 = vadd.f32 %v844_v58, %v741_v56  ;;  %v846_v60 = vpop.f32.mrb[7].mxu0  ;;  %939 = vmatpush1.bf16.msra.mxu1 %v889_v51  ;;  %v873_v62 = vmax.f32 %v841_v54, 0.0  ;;  %v914_v54 = vpop.permute.xlu0 %913 }
 0x193   : > { %v847_v61 = vadd.f32 %v846_v60, %v741_v56  ;;  %v874_v0 = vmax.f32 %v843_v57, 0.0  ;;  %v919_v58 = vpop.permute.xlu1 %918 }
 0x194   : > { %v875_v63 = vmax.f32 %v845_v59, 0.0 }
 0x195   : > { %v876_v1 = vmax.f32 %v847_v61, 0.0 }
 0x196   : > { %v891_v2 = vpack.c.bf16 %v875_v63, %v873_v62 }
 0x197   : > { %v892_v4 = vpack.c.bf16 %v876_v1, %v874_v0  ;;  %v850_v5 = vpop.f32.mrb[8].mxu0 }
 0x198   : > { %v851_v6 = vadd.f32 %v850_v5, %v746_v3  ;;  %v852_v7 = vpop.f32.mrb[9].mxu0 }
 0x199   : > { %v853_v9 = vadd.f32 %v852_v7, %v746_v3  ;;  %v854_v10 = vpop.f32.mrb[10].mxu0  ;;  %940 = vmatprep.subr.bf16.mxu1 %v892_v4  ;;  %v1008_v7 = vpop.permute.xlu0 %1007 }
 0x19a   : > { %v855_v11 = vadd.f32 %v854_v10, %v751_v8  ;;  %v856_v13 = vpop.f32.mrb[11].mxu0  ;;  %941 = vmatpush1.bf16.msra.mxu1 %v891_v2  ;;  %v877_v15 = vmax.f32 %v851_v6, 0.0  ;;  %v999_v6 = vld [vmem:[%s2171_s5] sm:$0x3] }
 0x19b   : > { %v857_v14 = vadd.f32 %v856_v13, %v751_v8  ;;  %v878_v17 = vmax.f32 %v853_v9, 0.0 }
 0x19c   : > { %v879_v16 = vmax.f32 %v855_v11, 0.0 }
 0x19d   : > { %v880_v18 = vmax.f32 %v857_v14, 0.0 }
 0x19e   : > { %v893_v19 = vpack.c.bf16 %v879_v16, %v877_v15 }
 0x19f   : > { %v894_v21 = vpack.c.bf16 %v880_v18, %v878_v17  ;;  %v860_v22 = vpop.f32.mrb[12].mxu0 }
 0x1a0   : > { %v861_v23 = vadd.f32 %v860_v22, %v756_v20  ;;  %v862_v24 = vpop.f32.mrb[13].mxu0 }
 0x1a1   : > { %v863_v26 = vadd.f32 %v862_v24, %v756_v20  ;;  %v864_v27 = vpop.f32.mrb[14].mxu0  ;;  %942 = vmatprep.subr.bf16.mxu1 %v894_v21 }
 0x1a2   : > { %v865_v28 = vadd.f32 %v864_v27, %v761_v25  ;;  %v866_v29 = vpop.f32.mrb[15].mxu0  ;;  %943 = vmatpush1.bf16.msra.mxu1 %v893_v19  ;;  %v881_v31 = vmax.f32 %v861_v23, 0.0 }
 0x1a3   : > { %v867_v30 = vadd.f32 %v866_v29, %v761_v25  ;;  %v882_v33 = vmax.f32 %v863_v26, 0.0 }
 0x1a4   : > { %v883_v32 = vmax.f32 %v865_v28, 0.0 }
 0x1a5   : > { %v884_v34 = vmax.f32 %v867_v30, 0.0 }
 0x1a6   : > { %v895_v35 = vpack.c.bf16 %v883_v32, %v881_v31 }
 0x1a7   : > { %v896_v36 = vpack.c.bf16 %v884_v34, %v882_v33 }
 0x1a9   : > { %944 = vmatprep.subr.bf16.mxu1 %v896_v36 }
 0x1aa   : > { %945 = vmatpush1.bf16.msra.mxu1 %v895_v35 }
 0x1ad   : > { %1265 = vmatmul.mubr.msk.bf16.vlgmr.msra.gmra.mrb[0].mxu1 %vm931_vm1, %v1455_v37 }
 0x1ae   : > { %980 = vmatprep.mubr.bf16.mxu1 %v1651_v12 }
 0x1b5   : > { %1266 = vmatmul.mubr.msk.bf16.gmra.mrb[4].mxu1 %vm931_vm1, %v1456_v38 }
 0x1b6   : > { %1046 = vmatprep.mubr.bf16.mxu1 %v1651_v12 }
 0x280   : > { %v972_v40 = vpop.f32.mrb[0].mxu1 }
 0x281   : > { %v973_v41 = vadd.f32 %v972_v40, %v904_v39  ;;  %v974_v42 = vpop.f32.mrb[1].mxu1 }
 0x282   : > { %v975_v44 = vadd.f32 %v974_v42, %v904_v39  ;;  %v976_v45 = vpop.f32.mrb[2].mxu1 }
 0x283   : > { %v977_v46 = vadd.f32 %v976_v45, %v909_v43  ;;  %v978_v47 = vpop.f32.mrb[3].mxu1  ;;  %v991_v49 = vmax.f32 %v973_v41, 0.0 }
 0x284   : > { %v979_v48 = vadd.f32 %v978_v47, %v909_v43  ;;  %v992_v51 = vmax.f32 %v975_v44, 0.0 }
 0x285   : > { %v993_v50 = vmax.f32 %v977_v46, 0.0 }
 0x286   : > { %v994_v52 = vmax.f32 %v979_v48, 0.0 }
 0x287   : > { %v1000_v53 = vpack.c.bf16 %v993_v50, %v991_v49 }
 0x288   : > { %v1001_v55 = vpack.c.bf16 %v994_v52, %v992_v51  ;;  %v982_v56 = vpop.f32.mrb[4].mxu1 }
 0x289   : > { %v983_v57 = vadd.f32 %v982_v56, %v914_v54  ;;  %v984_v12 = vpop.f32.mrb[5].mxu1 }
 0x28a   : > { %v985_v59 = vadd.f32 %v984_v12, %v914_v54  ;;  %v986_v60 = vpop.f32.mrb[6].mxu1  ;;  %1014 = vmatprep.subr.bf16.mxu1 %v1001_v55 }
 0x28b   : > { %v987_v61 = vadd.f32 %v986_v60, %v919_v58  ;;  %v988_v62 = vpop.f32.mrb[7].mxu1  ;;  %1015 = vmatpush1.bf16.msra.mxu1 %v1000_v53  ;;  %v995_v0 = vmax.f32 %v983_v57, 0.0 }
 0x28c   : > { %v989_v63 = vadd.f32 %v988_v62, %v919_v58  ;;  %v996_v2 = vmax.f32 %v985_v59, 0.0 }
 0x28d   : > { %v997_v1 = vmax.f32 %v987_v61, 0.0 }
 0x28e   : > { %v998_v3 = vmax.f32 %v989_v63, 0.0 }
 0x28f   : > { %v1002_v4 = vpack.c.bf16 %v997_v1, %v995_v0 }
 0x290   : > { %v1003_v5 = vpack.c.bf16 %v998_v3, %v996_v2 }
 0x292   : > { %1016 = vmatprep.subr.bf16.mxu1 %v1003_v5 }
 0x293   : > { %1017 = vmatpush1.bf16.msra.mxu1 %v1002_v4 }
 0x296   : > { %1267 = vmatmul.mubr.msk.bf16.vlgmr.msra.gmra.mrb[8].mxu1 %vm1010_vm2, %v999_v6 }
 0x369   : > { %v1048_v8 = vpop.f32.mrb[8].mxu1 }
 0x36a   : > { %v1049_v9 = vadd.f32 %v1048_v8, %v1008_v7  ;;  %v1050_v10 = vpop.f32.mrb[9].mxu1 }
 0x36b   : > { %v1051_v11 = vadd.f32 %v1050_v10, %v1008_v7  ;;  %v1052_v13 = vpop.f32.mrb[10].mxu1 }
 0x36c   : > { %v1053_v14 = vpop.f32.mrb[11].mxu1 }
 0x36d   : > { %v1057_v15 = vcombine.low %v1049_v9, %v1051_v11 }
 0x36f   : > { %1059 = vst [vmem:[%s693_s16] sm:$0xff] %v1057_v15 }
 0x370   : > { %1470 = shalt.err (!%p1467_p1)
}
 0x371   : > { %s1471_s29 = scalar_lea.hbm %s2122_s26, 128  ;;  %s1475_s23 = scalar_lea.hbm %s2173_s7, 256 }
 0x372   : > { %p1472_p2 = scmp.ne.s32.totalorder %s2122_s26, %s1471_s29  ;;  %p1476_p5 = scmp.lt.u32.totalorder %s2122_s26, %s2173_s7 }
 0x373   : > { %p1477_p7 = scmp.lt.u32.totalorder %s1475_s23, %s1471_s29  ;;  %p1479_p11 = scmp.lt.u32.totalorder %s1471_s29, %s2122_s26 }
 0x374   : > { %p1473_p3 = pnand %p1472_p2, %p1731_p6 }
 0x375   : > { %p1478_p10 = por %p1477_p7, %p1476_p5 }
 0x376   : > { %p1474_p4 = pneg %p1473_p3 }
 0x377   : > { %p1480_p12 = por %p1479_p11, %p1478_p10 }
 0x379   : > { %p1481_p13 = pnand %p1480_p12, %p1474_p4 }
 0x37b   : > { %1484 = shalt.err (!%p1481_p13)
}
 0x37c   : > { %1279 = dma.vmem_to_hbm [thread:$0]  (%p1731_p6), %s2124_s28, 128, %s2122_s26, %s1061_s17  }
 0x37d PF: > { %s1087_s13 = sand.u32 1, %s1571_s24   ;;  %p1282_p0 = pnand %p1224_p9, %p1735_p8 }
 0x37e   : > { %s1088_s0 = scalar_lea.sflag [#allocation4], %s1087_s13 }
 0x37f   : > { %1566 = dma.done.wait (!%p1282_p0), %s1088_s0, 128  }
 0x380   : > { %1568 = vsyncadd (!%p1282_p0), %s1088_s0, 4294967168  ;;  %s2196_s27 = sld [smem:[#allocation7_spill]]  ;;  %s2197_s19 = sld [smem:[#allocation6_spill]] }
 0x381   : > { %s2198_s26 = sld [smem:[#allocation8_spill]]  ;;  %s2199_s24 = smov %s1575_s25 }
 0x386   : > { %p17_p1 = scmp.ge.s32.totalorder %s2196_s27, 4   ;;  %s2200_s25 = smov %s2197_s19 }
 0x388   :  { %19 = sbr.rel (!%p17_p1) target bundleno = 5 (0x5), region = 216 }
 0x38f   :  { %1093 = vsyncpa [#allocation4], 1 }
 0x390   :  { %1095 = vsyncpa [#allocation4 + $0x1], 1 }

</bundles_post_ra>
